<compile_context>
chip_gen: v6e
topology: v6e:2x2x1
jax: 0.10.0
libtpu: 0.0.40
codegen_flags: <defaults>
</compile_context>

<pallas_src>
import functools

import jax
import jax.numpy as jnp
from jax.experimental import pallas as pl
from jax.experimental.pallas import tpu as pltpu


def _ce_per_sample_kernel(x_ref, t_ref, loss_ref, *, ignore_index):
    """Per-row softmax cross-entropy, reduction='none' (matches torch.nn.CrossEntropyLoss).

    x_ref:    (TILE_N, C) logits block (any float dtype, cast to f32 in-kernel)
    t_ref:    (TILE_N, 1) int32 class indices
    loss_ref: (TILE_N, 1) f32 per-sample loss (0 where target == ignore_index)
    """
    x = x_ref[...].astype(jnp.float32)
    t = t_ref[...]

    # Numerically-stable log-sum-exp over the class (lane) axis.
    m = jnp.max(x, axis=-1, keepdims=True)
    lse = m + jnp.log(jnp.sum(jnp.exp(x - m), axis=-1, keepdims=True))

    # x[i, t[i]] via a one-hot select (no gather needed on TPU).
    cols = jax.lax.broadcasted_iota(jnp.int32, x.shape, 1)
    tgt_logit = jnp.sum(jnp.where(cols == t, x, 0.0), axis=-1, keepdims=True)

    loss = lse - tgt_logit
    if ignore_index is not None:
        # PyTorch semantics: with reduction='none', ignored positions get loss 0.
        loss = jnp.where(t == ignore_index, 0.0, loss)
    loss_ref[...] = loss


def _per_sample_cross_entropy(logits, targets, ignore_index):
    """CrossEntropyLoss(reduction='none') for logits (N, C), int targets (N,)."""
    N, C = logits.shape

    # Tile the batch axis; keep each input block around <= 4 MiB so the
    # double-buffered footprint fits comfortably in VMEM on v5e/v6e/v7x.
    bytes_per_row = C * 4  # f32 in VMEM
    max_rows = max(8, (4 * 1024 * 1024) // bytes_per_row)
    tile_n = min(-(-N // 8) * 8, max_rows, 1024)
    tile_n = max(8, (tile_n // 8) * 8)
    n_pad = -(-N // tile_n) * tile_n

    x = logits  # no wrapper-side astype: cast happens inside the kernel
    t = targets.astype(jnp.int32).reshape(N, 1)
    if n_pad != N:
        x = jnp.pad(x, ((0, n_pad - N), (0, 0)))
        t = jnp.pad(t, ((0, n_pad - N), (0, 0)))

    kernel = functools.partial(_ce_per_sample_kernel, ignore_index=ignore_index)
    out = pl.pallas_call(
        kernel,
        out_shape=jax.ShapeDtypeStruct((n_pad, 1), jnp.float32),
        grid_spec=pltpu.PrefetchScalarGridSpec(
            num_scalar_prefetch=0,
            grid=(n_pad // tile_n,),
            in_specs=[
                pl.BlockSpec((tile_n, C), lambda i: (i, 0)),
                pl.BlockSpec((tile_n, 1), lambda i: (i, 0)),
            ],
            out_specs=pl.BlockSpec((tile_n, 1), lambda i: (i, 0)),
        ),
        compiler_params=pltpu.CompilerParams(
            dimension_semantics=("parallel",),  # independent blocks -> megacore on v7x
        ),
    )(x, t)
    return out[:N, 0]


def cross_entropy_loss_ohem(logits, targets, ignore_index=None, top_k=0.75):
    """Forward pass of CrossEntropyLossOHEM for (N, C) logits and (N,) int targets."""
    loss = _per_sample_cross_entropy(logits, targets, ignore_index)
    n = loss.shape[0]
    if top_k == 1:
        return jnp.mean(loss)
    k = int(top_k * n)  # same as torch: int(self.top_k * loss.size()[0])
    # TODO(synk): top-k selection (torch.topk) has no clean TPU Pallas primitive
    # (sort-based); done with jax.lax.top_k on the tiny (N,) per-sample loss vector.
    valid_loss, _ = jax.lax.top_k(loss, k)
    return jnp.mean(valid_loss)


if __name__ == "__main__":
    key = jax.random.PRNGKey(0)
    k1, k2 = jax.random.split(key)

    # Classification-style inputs implied by the module's forward:
    #   input (N, C) logits, target (N,) int class indices.
    N, C = 64, 32
    ignore_index = -1
    top_k = 0.75

    logits = jax.random.normal(k1, (N, C), dtype=jnp.float32)
    targets = jax.random.randint(k2, (N,), 0, C, dtype=jnp.int32)
    targets = targets.at[::16].set(ignore_index)  # exercise the ignore_index path

    out = cross_entropy_loss_ohem(logits, targets, ignore_index=ignore_index, top_k=top_k)
    out = jax.block_until_ready(out)

    # Pure-JAX reference (same semantics as the PyTorch module).
    logp = jax.nn.log_softmax(logits.astype(jnp.float32), axis=-1)
    safe_t = jnp.clip(targets, 0, C - 1)
    nll = -jnp.take_along_axis(logp, safe_t[:, None], axis=-1)[:, 0]
    nll = jnp.where(targets == ignore_index, 0.0, nll)
    k = int(top_k * N)
    ref = jnp.mean(jax.lax.top_k(nll, k)[0])
    assert jnp.allclose(out, ref, rtol=1e-5, atol=1e-5), (out, ref)

    # Also check the top_k == 1 (plain mean) path.
    out_mean = jax.block_until_ready(
        cross_entropy_loss_ohem(logits, targets, ignore_index=ignore_index, top_k=1)
    )
    ref_mean = jnp.mean(nll)
    assert jnp.allclose(out_mean, ref_mean, rtol=1e-5, atol=1e-5), (out_mean, ref_mean)

    print("KERNEL_OK")
</pallas_src>

<mosaic_0001>
module attributes {stable_mosaic.version = 11 : i64} {
  func.func @_ce_per_sample_kernel(%arg0: i32, %arg1: memref<64x32xf32, #tpu.memory_space<vmem>>, %arg2: memref<64x1xi32, #tpu.memory_space<vmem>>, %arg3: memref<64x1xf32, #tpu.memory_space<vmem>>) attributes {dimension_semantics = [#tpu.dimension_semantics<parallel>], iteration_bounds = array<i64: 1>, scalar_prefetch = 0 : i64, scratch_operands = 0 : i64, tpu.core_type = #tpu.core_type<tc>, window_params = [{transform_indices = @transform_0, window_bounds = array<i64: 64, 32>}, {transform_indices = @transform_1, window_bounds = array<i64: 64, 1>}, {transform_indices = @transform_2, window_bounds = array<i64: 64, 1>}]} {
    %c0 = arith.constant 0 : index
    %c0_0 = arith.constant 0 : index
    %0 = vector.load %arg1[%c0, %c0_0] : memref<64x32xf32, #tpu.memory_space<vmem>>, vector<64x32xf32>
    %c0_1 = arith.constant 0 : index
    %c0_2 = arith.constant 0 : index
    %1 = vector.load %arg2[%c0_1, %c0_2] : memref<64x1xi32, #tpu.memory_space<vmem>>, vector<64x1xi32>
    %cst = arith.constant dense<0xFF800000> : vector<64xf32>
    %2 = vector.multi_reduction <maximumf>, %0, %cst [1] : vector<64x32xf32> to vector<64xf32>
    %3 = vector.shape_cast %2 : vector<64xf32> to vector<64x1xf32>
    %4 = vector.broadcast %3 : vector<64x1xf32> to vector<64x32xf32>
    %5 = arith.subf %0, %4 : vector<64x32xf32>
    %6 = math.exp %5 : vector<64x32xf32>
    %cst_3 = arith.constant dense<0.000000e+00> : vector<64xf32>
    %7 = vector.multi_reduction <add>, %6, %cst_3 [1] : vector<64x32xf32> to vector<64xf32>
    %8 = vector.shape_cast %7 : vector<64xf32> to vector<64x1xf32>
    %9 = math.log %8 : vector<64x1xf32>
    %10 = arith.addf %3, %9 : vector<64x1xf32>
    %11 = tpu.iota {dimensions = array<i32: 1>} : vector<64x32xi32>
    %12 = vector.broadcast %1 : vector<64x1xi32> to vector<64x32xi32>
    %13 = arith.cmpi eq, %11, %12 : vector<64x32xi32>
    %cst_4 = arith.constant 0.000000e+00 : f32
    %14 = vector.broadcast %cst_4 : f32 to vector<64x32xf32>
    %15 = arith.select %13, %0, %14 : vector<64x32xi1>, vector<64x32xf32>
    %cst_5 = arith.constant dense<0.000000e+00> : vector<64xf32>
    %16 = vector.multi_reduction <add>, %15, %cst_5 [1] : vector<64x32xf32> to vector<64xf32>
    %17 = vector.shape_cast %16 : vector<64xf32> to vector<64x1xf32>
    %18 = arith.subf %10, %17 : vector<64x1xf32>
    %c-1_i32 = arith.constant -1 : i32
    %19 = vector.broadcast %c-1_i32 : i32 to vector<64x1xi32>
    %20 = arith.cmpi eq, %1, %19 : vector<64x1xi32>
    %cst_6 = arith.constant 0.000000e+00 : f32
    %21 = vector.broadcast %cst_6 : f32 to vector<64x1xf32>
    %22 = arith.select %20, %21, %18 : vector<64x1xi1>, vector<64x1xf32>
    %c0_7 = arith.constant 0 : index
    %c0_8 = arith.constant 0 : index
    %23 = vector.load %arg3[%c0_7, %c0_8] : memref<64x1xf32, #tpu.memory_space<vmem>>, vector<64x1xf32>
    tpu.vector_store %arg3[%c0_7, %c0_8], %22 {strides = array<i32>} : memref<64x1xf32, #tpu.memory_space<vmem>>, vector<64x1xf32>,
    return
  }
  func.func @transform_0(%arg0: i32) -> (i32, i32) {
    %c0_i32 = arith.constant 0 : i32
    %c0_i32_0 = arith.constant 0 : i32
    return %arg0, %c0_i32 : i32, i32
  }
  func.func @transform_1(%arg0: i32) -> (i32, i32) {
    %c0_i32 = arith.constant 0 : i32
    %c0_i32_0 = arith.constant 0 : i32
    return %arg0, %c0_i32 : i32, i32
  }
  func.func @transform_2(%arg0: i32) -> (i32, i32) {
    %c0_i32 = arith.constant 0 : i32
    %c0_i32_0 = arith.constant 0 : i32
    return %arg0, %c0_i32 : i32, i32
  }
}

</mosaic_0001>

<bundles_post_ra>
// kernel: tpu_custom_call.1
= control target key start
LH: loop header
LB: loop body
LE: loop exit
PB: predicated region body
PF: predicated region fallthrough
CT: control target
= control target key end

     0   :  { %vm27_vm0 = vcmask 261120   ;;  %v262_v3 = vmov 0   ;;  %v124_v54 = vlaneseq  ;;  %vm214_vm10 = vcmask 7168   ;;  %s486_s0 = inlined_call_operand.vmem [shape: f32[64,32], index: 0, kind: input, shape index: {}]   ;;  %s487_s1 = inlined_call_operand.vmem [shape: s32[64,1], index: 1, kind: input, shape index: {}]   ;;  %s488_s2 = inlined_call_operand.vmem [shape: f32[64,1], index: 2, kind: output, shape index: {}]  }
   0x1   :  { %v281_v0 = vld [vmem:[%s486_s0 + $0x10] sm:$0xff]  ;;  %v286_v1 = vld [vmem:[%s486_s0] sm:$0xff]  ;;  %v291_v2 = vld [vmem:[%s486_s0 + $0x18] sm:$0xff]  ;;  %229 = vset.pattern.permute.xlu1 %v262_v3  ;;  %228 = vset.pattern.permute.xlu0 %v262_v3 }
   0x2   :  { %v34_v4 = vsel %vm27_vm0, %v281_v0, -inf  ;;  %v28_v5 = vsel %vm27_vm0, %v286_v1, -inf  ;;  %v300_v6 = vld [vmem:[%s486_s0 + $0x8] sm:$0xff]  ;;  %v37_v7 = vsel %vm27_vm0, %v291_v2, -inf  ;;  %v314_v10 = vld [vmem:[%s486_s0 + $0x20] sm:$0xff]  ;;  %v323_v13 = vld [vmem:[%s486_s0 + $0x38] sm:$0xff] }
   0x3   :  { %35 = vmax.xlane.f32.xlu1 %v34_v4  ;;  %29 = vmax.xlane.f32.xlu0 %v28_v5  ;;  %v31_v8 = vsel %vm27_vm0, %v300_v6, -inf  ;;  %v309_v9 = vld [vmem:[%s486_s0 + $0x28] sm:$0xff]  ;;  %v40_v12 = vsel %vm27_vm0, %v314_v10, -inf  ;;  %v328_v14 = vld [vmem:[%s486_s0 + $0x30] sm:$0xff]  ;;  %v49_v15 = vsel %vm27_vm0, %v323_v13, -inf  ;;  %v348_v19 = vld [vmem:[%s487_s1] sm:$0xff] }
   0x4   :  { %v43_v11 = vsel %vm27_vm0, %v309_v9, -inf  ;;  %v46_v16 = vsel %vm27_vm0, %v328_v14, -inf  ;;  %v337_v17 = vld [vmem:[%s487_s1 + $0x8] sm:$0xff]  ;;  %v343_v18 = vld [vmem:[%s487_s1 + $0x10] sm:$0xff]  ;;  %v354_v20 = vld [vmem:[%s487_s1 + $0x18] sm:$0xff]  ;;  %v125_v61 = vand.u32 127, %v124_v54 }
   0x5   :  { %v361_v21 = vld [vmem:[%s487_s1 + $0x20] sm:$0xff]  ;;  %v367_v22 = vld [vmem:[%s487_s1 + $0x28] sm:$0xff]  ;;  %v373_v23 = vld [vmem:[%s487_s1 + $0x30] sm:$0xff]  ;;  %vm198_vm9 = vcmp.eq.s32.totalorder %v348_v19, 4294967295  ;;  %vm201_vm11 = vcmp.eq.s32.totalorder %v354_v20, 4294967295  ;;  %vm199_vm12 = vcmp.eq.s32.totalorder %v337_v17, 4294967295 }
   0x6   :  { %v379_v24 = vld [vmem:[%s487_s1 + $0x38] sm:$0xff]  ;;  %vm203_vm13 = vcmp.eq.s32.totalorder %v367_v22, 4294967295  ;;  %vm200_vm14 = vcmp.eq.s32.totalorder %v343_v18, 4294967295 }
   0x7   :  { %38 = vmax.xlane.f32.xlu1 %v37_v7  ;;  %32 = vmax.xlane.f32.xlu0 %v31_v8  ;;  %vm205_vm15 = vcmp.eq.s32.totalorder %v379_v24, 4294967295 }
   0xb   :  { %44 = vmax.xlane.f32.xlu1 %v43_v11  ;;  %41 = vmax.xlane.f32.xlu0 %v40_v12 }
   0xf   :  { %50 = vmax.xlane.f32.xlu1 %v49_v15  ;;  %47 = vmax.xlane.f32.xlu0 %v46_v16 }
  0x20   :  { %130 = vperm.xlu1 %229, %v337_v17  }
  0x24   :  { %133 = vperm.xlu1 %229, %v343_v18  }
  0x25   :  { %127 = vperm.xlu0 %228, %v348_v19  }
  0x28   :  { %136 = vperm.xlu1 %229, %v354_v20  }
  0x2c   :  { %139 = vperm.xlu1 %229, %v361_v21  }
  0x30   :  { %142 = vperm.xlu1 %229, %v367_v22  }
  0x34   :  { %145 = vperm.xlu1 %229, %v373_v23  }
  0x38   :  { %148 = vperm.xlu1 %229, %v379_v24  }
  0x8c   :  { %v382_v25 = vpop.xlane.xlu1 %35  ;;  %v384_v26 = vpop.xlane.xlu0 %29 }
  0x8d   :  { %v52_v27 = vsub.f32 %v286_v1, %v384_v26  ;;  %v54_v29 = vsub.f32 %v281_v0, %v382_v25 }
  0x8f   :  { %v60_v28 = vmul.f32 1.442695, %v52_v27  ;;  %v64_v36 = vmul.f32 1.442695, %v54_v29 }
  0x90   :  { %v390_v30 = vpop.xlane.xlu1 %38  ;;  %v392_v31 = vpop.xlane.xlu0 %32 }
  0x91   :  { %v55_v32 = vsub.f32 %v291_v2, %v390_v30  ;;  %v53_v33 = vsub.f32 %v300_v6, %v392_v31  ;;  %230 = vpow2.f32 %v60_v28 }
  0x93   :  { %v66_v34 = vmul.f32 1.442695, %v55_v32  ;;  %v62_v35 = vmul.f32 1.442695, %v53_v33 }
  0x94   :  { %v398_v37 = vpop.xlane.xlu1 %44  ;;  %v400_v38 = vpop.xlane.xlu0 %41 }
  0x95   :  { %232 = vpow2.f32 %v66_v34  ;;  %v57_v39 = vsub.f32 %v309_v9, %v398_v37  ;;  %v56_v40 = vsub.f32 %v314_v10, %v400_v38 }
  0x96   :  { %234 = vpow2.f32 %v62_v35 }
  0x97   :  { %v70_v41 = vmul.f32 1.442695, %v57_v39  ;;  %v68_v42 = vmul.f32 1.442695, %v56_v40  ;;  %236 = vpow2.f32 %v64_v36 }
  0x98   :  { %v406_v43 = vpop.xlane.xlu1 %50  ;;  %v408_v44 = vpop.xlane.xlu0 %47 }
  0x99   :  { %238 = vpow2.f32 %v70_v41  ;;  %v59_v45 = vsub.f32 %v323_v13, %v406_v43  ;;  %v58_v46 = vsub.f32 %v328_v14, %v408_v44 }
  0x9a   :  { %240 = vpow2.f32 %v68_v42 }
  0x9b   :  { %v74_v47 = vmul.f32 1.442695, %v59_v45  ;;  %v72_v48 = vmul.f32 1.442695, %v58_v46 }
  0x9c   :  { %v131_v49 = vpop.permute.xlu1 %130 }
  0x9d   :  { %242 = vpow2.f32 %v74_v47  ;;  %vm151_vm1 = vcmp.eq.s32.totalorder %v125_v61, %v131_v49 }
  0x9e   :  { %244 = vpow2.f32 %v72_v48  ;;  %v231_v50 = vpop.eup %230  ;;  %v159_v16 = vsel %vm151_vm1, %v300_v6, 0.0  ;;  %vm204_vm1 = vcmp.eq.s32.totalorder %v373_v23, 4294967295 }
  0x9f   :  { %v76_v52 = vsel %vm27_vm0, %v231_v50, 0.0  ;;  %v169_v32 = vsel %vm27_vm0, %v159_v16, 0.0 }
  0xa0   :  { %v134_v51 = vpop.permute.xlu1 %133  ;;  %77 = vadd.xlane.f32.xlu1 %v76_v52  ;;  %v128_v5 = vpop.permute.xlu0 %127 }
  0xa1   :  { %vm150_vm2 = vcmp.eq.s32.totalorder %v125_v61, %v128_v5  ;;  %vm152_vm4 = vcmp.eq.s32.totalorder %v125_v61, %v134_v51 }
  0xa2   :  { %v233_v53 = vpop.eup %232  ;;  %v158_v28 = vsel %vm150_vm2, %v286_v1, 0.0  ;;  %v160_v1 = vsel %vm152_vm4, %v281_v0, 0.0 }
  0xa3   :  { %v235_v55 = vpop.eup %234  ;;  %v85_v56 = vsel %vm27_vm0, %v233_v53, 0.0  ;;  %v166_v34 = vsel %vm27_vm0, %v158_v28, 0.0  ;;  %v172_v40 = vsel %vm27_vm0, %v160_v1, 0.0 }
  0xa4   :  { %v137_v57 = vpop.permute.xlu1 %136  ;;  %v79_v58 = vsel %vm27_vm0, %v235_v55, 0.0  ;;  %v237_v59 = vpop.eup %236  ;;  %86 = vadd.xlane.f32.xlu1 %v85_v56 }
  0xa5   :  { %80 = vadd.xlane.f32.xlu0 %v79_v58  ;;  %v82_v4 = vsel %vm27_vm0, %v237_v59, 0.0  ;;  %vm153_vm3 = vcmp.eq.s32.totalorder %v125_v61, %v137_v57 }
  0xa6   :  { %v239_v60 = vpop.eup %238  ;;  %v161_v33 = vsel %vm153_vm3, %v291_v2, 0.0 }
  0xa7   :  { %v241_v62 = vpop.eup %240  ;;  %v91_v63 = vsel %vm27_vm0, %v239_v60, 0.0  ;;  %v175_v36 = vsel %vm27_vm0, %v161_v33, 0.0 }
  0xa8   :  { %v140_v3 = vpop.permute.xlu1 %139  ;;  %92 = vadd.xlane.f32.xlu1 %v91_v63  ;;  %v88_v8 = vsel %vm27_vm0, %v241_v62, 0.0 }
  0xa9   :  { %83 = vadd.xlane.f32.xlu0 %v82_v4  ;;  %vm154_vm6 = vcmp.eq.s32.totalorder %v125_v61, %v140_v3 }
  0xaa   :  { %v243_v7 = vpop.eup %242  ;;  %v162_v41 = vsel %vm154_vm6, %v314_v10, 0.0 }
  0xab   :  { %v245_v11 = vpop.eup %244  ;;  %v97_v12 = vsel %vm27_vm0, %v243_v7, 0.0  ;;  %v178_v45 = vsel %vm27_vm0, %v162_v41, 0.0 }
  0xac   :  { %v143_v15 = vpop.permute.xlu1 %142  ;;  %98 = vadd.xlane.f32.xlu1 %v97_v12  ;;  %v94_v27 = vsel %vm27_vm0, %v245_v11, 0.0 }
  0xad   :  { %89 = vadd.xlane.f32.xlu0 %v88_v8  ;;  %vm155_vm5 = vcmp.eq.s32.totalorder %v125_v61, %v143_v15 }
  0xae   :  { %v163_v6 = vsel %vm155_vm5, %v309_v9, 0.0 }
  0xaf   :  { %v181_v39 = vsel %vm27_vm0, %v163_v6, 0.0 }
  0xb0   :  { %v146_v29 = vpop.permute.xlu1 %145  ;;  %170 = vadd.xlane.f32.xlu1 %v169_v32 }
  0xb1   :  { %95 = vadd.xlane.f32.xlu0 %v94_v27  ;;  %vm156_vm8 = vcmp.eq.s32.totalorder %v125_v61, %v146_v29 }
  0xb2   :  { %v164_v0 = vsel %vm156_vm8, %v328_v14, 0.0 }
  0xb3   :  { %v184_v9 = vsel %vm27_vm0, %v164_v0, 0.0 }
  0xb4   :  { %v149_v35 = vpop.permute.xlu1 %148  ;;  %176 = vadd.xlane.f32.xlu1 %v175_v36 }
  0xb5   :  { %167 = vadd.xlane.f32.xlu0 %v166_v34  ;;  %vm157_vm7 = vcmp.eq.s32.totalorder %v125_v61, %v149_v35 }
  0xb6   :  { %v165_v2 = vsel %vm157_vm7, %v323_v13, 0.0 }
  0xb7   :  { %v187_v42 = vsel %vm27_vm0, %v165_v2, 0.0  ;;  %vm202_vm0 = vcmp.eq.s32.totalorder %v361_v21, 4294967295 }
  0xb8   :  { %182 = vadd.xlane.f32.xlu1 %v181_v39 }
  0xb9   :  { %173 = vadd.xlane.f32.xlu0 %v172_v40 }
  0xbc   :  { %188 = vadd.xlane.f32.xlu1 %v187_v42 }
  0xbd   :  { %179 = vadd.xlane.f32.xlu0 %v178_v45 }
  0xc1   :  { %185 = vadd.xlane.f32.xlu0 %v184_v9 }
 0x129   :  { %v78_v46 = vpop.xlane.xlu1 %77 }
 0x12a   :  { %246 = vlog2.f32 %v78_v46 }
 0x12d   :  { %v87_v47 = vpop.xlane.xlu1 %86 }
 0x12e   :  { %v81_v48 = vpop.xlane.xlu0 %80  ;;  %248 = vlog2.f32 %v87_v47 }
 0x12f   :  { %250 = vlog2.f32 %v81_v48 }
 0x131   :  { %v93_v13 = vpop.xlane.xlu1 %92 }
 0x132   :  { %v84_v10 = vpop.xlane.xlu0 %83  ;;  %252 = vlog2.f32 %v93_v13 }
 0x133   :  { %254 = vlog2.f32 %v84_v10 }
 0x135   :  { %v99_v49 = vpop.xlane.xlu1 %98 }
 0x136   :  { %v90_v50 = vpop.xlane.xlu0 %89  ;;  %256 = vlog2.f32 %v99_v49 }
 0x137   :  { %v247_v51 = vpop.eup %246  ;;  %258 = vlog2.f32 %v90_v50 }
 0x138   :  { %v101_v52 = vmul.f32 0.6931472, %v247_v51 }
 0x139   :  { %v171_v14 = vpop.xlane.xlu1 %170 }
 0x13a   :  { %v96_v53 = vpop.xlane.xlu0 %95  ;;  %v116_v57 = vadd.f32 %v101_v52, %v384_v26 }
 0x13b   :  { %260 = vlog2.f32 %v96_v53  ;;  %v249_v54 = vpop.eup %248 }
 0x13c   :  { %v251_v55 = vpop.eup %250  ;;  %v107_v56 = vmul.f32 0.6931472, %v249_v54 }
 0x13d   :  { %v103_v58 = vmul.f32 0.6931472, %v251_v55  ;;  %v177_v59 = vpop.xlane.xlu1 %176 }
 0x13e   :  { %v168_v60 = vpop.xlane.xlu0 %167  ;;  %v119_v61 = vadd.f32 %v107_v56, %v390_v30 }
 0x13f   :  { %v190_v62 = vsub.f32 %v116_v57, %v168_v60  ;;  %v253_v63 = vpop.eup %252  ;;  %v117_v3 = vadd.f32 %v103_v58, %v392_v31 }
 0x140   :  { %v255_v4 = vpop.eup %254  ;;  %v111_v5 = vmul.f32 0.6931472, %v253_v63  ;;  %v193_v7 = vsub.f32 %v119_v61, %v177_v59 }
 0x141   :  { %v206_v26 = vsel %vm198_vm9, 0.0, %v190_v62  ;;  %v105_v8 = vmul.f32 0.6931472, %v255_v4  ;;  %v191_v19 = vsub.f32 %v117_v3, %v171_v14  ;;  %v183_v30 = vpop.xlane.xlu1 %182 }
 0x142   :  { %215 = vst.msk [vmem:[%s488_s2] sm:$0xff] %vm214_vm10, %v206_v26  ;;  %v174_v11 = vpop.xlane.xlu0 %173  ;;  %v209_v12 = vsel %vm201_vm11, 0.0, %v193_v7  ;;  %v121_v20 = vadd.f32 %v111_v5, %v398_v37 }
 0x143   :  { %v257_v15 = vpop.eup %256  ;;  %v207_v31 = vsel %vm199_vm12, 0.0, %v191_v19  ;;  %218 = vst.msk [vmem:[%s488_s2 + $0x18] sm:$0xff] %vm214_vm10, %v209_v12  ;;  %v118_v17 = vadd.f32 %v105_v8, %v382_v25 }
 0x144   :  { %v259_v16 = vpop.eup %258  ;;  %v115_v27 = vmul.f32 0.6931472, %v257_v15  ;;  %216 = vst.msk [vmem:[%s488_s2 + $0x8] sm:$0xff] %vm214_vm10, %v207_v31  ;;  %v195_v37 = vsub.f32 %v121_v20, %v183_v30 }
 0x145   :  { %v109_v28 = vmul.f32 0.6931472, %v259_v16  ;;  %v192_v22 = vsub.f32 %v118_v17, %v174_v11  ;;  %v189_v25 = vpop.xlane.xlu1 %188 }
 0x146   :  { %v180_v29 = vpop.xlane.xlu0 %179  ;;  %v211_v32 = vsel %vm203_vm13, 0.0, %v195_v37  ;;  %v123_v33 = vadd.f32 %v115_v27, %v406_v43 }
 0x147   :  { %220 = vst.msk [vmem:[%s488_s2 + $0x28] sm:$0xff] %vm214_vm10, %v211_v32  ;;  %v208_v18 = vsel %vm200_vm14, 0.0, %v192_v22  ;;  %v120_v35 = vadd.f32 %v109_v28, %v400_v38 }
 0x148   :  { %v261_v34 = vpop.eup %260  ;;  %217 = vst.msk [vmem:[%s488_s2 + $0x10] sm:$0xff] %vm214_vm10, %v208_v18  ;;  %v197_v43 = vsub.f32 %v123_v33, %v189_v25 }
 0x149   :  { %v113_v36 = vmul.f32 0.6931472, %v261_v34  ;;  %v194_v6 = vsub.f32 %v120_v35, %v180_v29 }
 0x14a   :  { %v213_v24 = vsel %vm205_vm15, 0.0, %v197_v43  ;;  %v186_v21 = vpop.xlane.xlu0 %185 }
 0x14b   :  { %v122_v1 = vadd.f32 %v113_v36, %v408_v44  ;;  %222 = vst.msk [vmem:[%s488_s2 + $0x38] sm:$0xff] %vm214_vm10, %v213_v24  ;;  %v210_v38 = vsel %vm202_vm0, 0.0, %v194_v6 }
 0x14c   :  { %219 = vst.msk [vmem:[%s488_s2 + $0x20] sm:$0xff] %vm214_vm10, %v210_v38 }
 0x14d   :  { %v196_v39 = vsub.f32 %v122_v1, %v186_v21 }
 0x14f   :  { %v212_v40 = vsel %vm204_vm1, 0.0, %v196_v39 }
 0x150   :  { %221 = vst.msk [vmem:[%s488_s2 + $0x30] sm:$0xff] %vm214_vm10, %v212_v40 }

</bundles_post_ra>
